<compile_context>
chip_gen: v7x
topology: tpu7x:2x2x1
jax: 0.10.0
libtpu: 0.0.40
codegen_flags: <defaults>
</compile_context>

<pallas_src>
import functools

import jax
import jax.numpy as jnp
import numpy as np
from jax.experimental import pallas as pl
from jax.experimental.pallas import tpu as pltpu


def _mhsa_kernel(x_ref, wqkv_ref, bqkv_ref, wp_ref, bp_ref, gamma_ref, beta_ref,
                 o_ref, acc_ref, *, num_heads, d_attention, ln_eps):
    h = pl.program_id(1)
    bt, S, D = x_ref.shape
    rows = bt * S
    dA = d_attention

    x = x_ref[...].reshape(rows, D)                   # (rows, D) f32
    x_b = x.astype(jnp.bfloat16)

    # Fused per-head QKV projection: one MXU matmul per step.
    qkv = jnp.dot(x_b, wqkv_ref[0],
                  preferred_element_type=jnp.float32) + bqkv_ref[0]   # (rows, 3*dA)

    scale = 1.0 / np.sqrt(dA)
    q = (qkv[:, 0 * dA:1 * dA] * scale).astype(jnp.bfloat16).reshape(bt, S, dA)
    k = qkv[:, 1 * dA:2 * dA].astype(jnp.bfloat16).reshape(bt, S, dA)
    v = qkv[:, 2 * dA:3 * dA].astype(jnp.bfloat16).reshape(bt, S, dA)

    # Scores: batched over the bt batch elements, no explicit K transpose.
    scores = jnp.einsum("bqd,bkd->bqk", q, k,
                        preferred_element_type=jnp.float32)           # (bt, S, S)
    scores = scores - jnp.max(scores, axis=-1, keepdims=True)
    p = jnp.exp(scores)
    denom = jnp.sum(p, axis=-1, keepdims=True)
    p = p * pl.reciprocal(denom, approx=True)         # softmax over keys (dim=2)

    attn_h = jnp.einsum("bqk,bkd->bqd", p.astype(jnp.bfloat16), v,
                        preferred_element_type=jnp.float32)           # (bt, S, dA)

    # Per-head slice of the output projection, accumulated across heads:
    # post = sum_h attn_h @ Wp[h*dA:(h+1)*dA, :]
    contrib = jnp.dot(attn_h.reshape(rows, dA).astype(jnp.bfloat16), wp_ref[0],
                      preferred_element_type=jnp.float32)             # (rows, D)

    @pl.when(h == 0)
    def _():
        acc_ref[...] = jnp.zeros_like(acc_ref)

    acc_ref[...] += contrib

    @pl.when(h == num_heads - 1)
    def _():
        post = acc_ref[...] + bp_ref[...]             # eval-mode dropout = id
        res = x + post                                # residual
        mean = jnp.mean(res, axis=-1, keepdims=True)
        centered = res - mean
        var = jnp.mean(centered * centered, axis=-1, keepdims=True)
        normed = centered * jax.lax.rsqrt(var + ln_eps)
        out = normed * gamma_ref[...] + beta_ref[...]
        o_ref[...] = out.reshape(bt, S, D).astype(o_ref.dtype)


def _choose_batch_tile(B, S, target_rows=512):
    """Largest divisor of B such that bt*S stays within a modest row budget."""
    best = 1
    for cand in range(1, B + 1):
        if B % cand == 0 and cand * S <= max(S, target_rows):
            best = cand
    return best


def _pack_params(params, num_heads):
    """Repack (D,D)/(1,D) params into head-major, bf16 weight layouts."""
    D = params["wq"].shape[0]
    dA = D // num_heads

    def per_head_w(w):                                # (D, D) -> (H, D, dA)
        return jnp.transpose(w.reshape(D, num_heads, dA), (1, 0, 2))

    def per_head_b(b):                                # (1, D) -> (H, 1, dA)
        return b.reshape(num_heads, 1, dA)

    wqkv = jnp.concatenate([per_head_w(params["wq"]),
                            per_head_w(params["wk"]),
                            per_head_w(params["wv"])], axis=-1)   # (H, D, 3*dA)
    bqkv = jnp.concatenate([per_head_b(params["bq"]),
                            per_head_b(params["bk"]),
                            per_head_b(params["bv"])], axis=-1)   # (H, 1, 3*dA)
    wp_h = params["wp"].reshape(num_heads, dA, D)                  # (H, dA, D)

    return (wqkv.astype(jnp.bfloat16),
            bqkv.astype(jnp.float32),
            wp_h.astype(jnp.bfloat16))


def fft_mhsa_pallas(x, params, num_heads):
    B, S, D = x.shape
    dA = D // num_heads
    bt = _choose_batch_tile(B, S)
    wqkv, bqkv, wp_h = _pack_params(params, num_heads)

    kernel = functools.partial(
        _mhsa_kernel, num_heads=num_heads, d_attention=dA, ln_eps=1e-5)

    return pl.pallas_call(
        kernel,
        out_shape=jax.ShapeDtypeStruct((B, S, D), jnp.float32),
        grid=(B // bt, num_heads),
        in_specs=[
            pl.BlockSpec((bt, S, D), lambda b, h: (b, 0, 0)),        # x
            pl.BlockSpec((1, D, 3 * dA), lambda b, h: (h, 0, 0)),    # fused Wqkv (bf16)
            pl.BlockSpec((1, 1, 3 * dA), lambda b, h: (h, 0, 0)),    # fused bqkv
            pl.BlockSpec((1, dA, D), lambda b, h: (h, 0, 0)),        # Wpost slice (bf16)
            pl.BlockSpec((1, D), lambda b, h: (0, 0)),               # bpost
            pl.BlockSpec((1, D), lambda b, h: (0, 0)),               # ln gamma
            pl.BlockSpec((1, D), lambda b, h: (0, 0)),               # ln beta
        ],
        out_specs=pl.BlockSpec((bt, S, D), lambda b, h: (b, 0, 0)),
        scratch_shapes=[pltpu.VMEM((bt * S, D), jnp.float32)],       # post accumulator
        compiler_params=pltpu.CompilerParams(
            dimension_semantics=("parallel", "arbitrary")),
    )(x, wqkv, bqkv, wp_h, params["bp"], params["gamma"], params["beta"])


def _reference(x, params, num_heads):
    """Pure-JAX f32 reference mirroring the PyTorch forward (eval mode)."""
    B, S, D = x.shape
    dA = D // num_heads
    q = x @ params["wq"] + params["bq"]
    k = x @ params["wk"] + params["bk"]
    v = x @ params["wv"] + params["bv"]

    def split(t):  # (B,S,D) -> (H*B, S, dA) matching torch permute(2,0,1,3)
        t = t.reshape(B, S, num_heads, dA).transpose(2, 0, 1, 3)
        return t.reshape(num_heads * B, S, dA)

    qh, kh, vh = split(q), split(k), split(v)
    w = jnp.einsum("bqd,bkd->bqk", qh, kh) / np.sqrt(dA)
    w = jax.nn.softmax(w, axis=2)
    attn = jnp.einsum("bqk,bkd->bqd", w, vh)
    attn = attn.reshape(num_heads, B, S, dA).transpose(1, 2, 0, 3).reshape(B, S, D)
    post = attn @ params["wp"] + params["bp"]
    res = x + post
    mean = res.mean(-1, keepdims=True)
    var = ((res - mean) ** 2).mean(-1, keepdims=True)
    return (res - mean) / jnp.sqrt(var + 1e-5) * params["gamma"] + params["beta"]


def init_params(key, d_model):
    """Deterministic init mimicking nn.Linear's U(-1/sqrt(d), 1/sqrt(d))."""
    bound = 1.0 / np.sqrt(d_model)
    keys = jax.random.split(key, 8)

    def mat(k):
        return jax.random.uniform(k, (d_model, d_model), jnp.float32, -bound, bound)

    def vec(k):
        return jax.random.uniform(k, (1, d_model), jnp.float32, -bound, bound)

    return {
        "wq": mat(keys[0]), "bq": vec(keys[1]),
        "wk": mat(keys[2]), "bk": vec(keys[3]),
        "wv": mat(keys[4]), "bv": vec(keys[5]),
        "wp": mat(keys[6]), "bp": vec(keys[7]),
        "gamma": jnp.ones((1, d_model), jnp.float32),
        "beta": jnp.zeros((1, d_model), jnp.float32),
    }


if __name__ == "__main__":
    num_heads = 4
    d_model = 32
    batch_size = 2
    seq_len = 8

    root = jax.random.PRNGKey(0)
    k_x, k_p = jax.random.split(root)
    x = jax.random.normal(k_x, (batch_size, seq_len, d_model), jnp.float32)
    params = init_params(k_p, d_model)

    out = fft_mhsa_pallas(x, params, num_heads)
    out = jax.block_until_ready(out)

    ref = _reference(x, params, num_heads)
    # Tolerance is loosened vs. the pure-f32 version because the kernel runs
    # its matmuls in bf16 (f32 accumulation) and uses the EUP approximate
    # reciprocal for the softmax denominator.
    np.testing.assert_allclose(np.asarray(out), np.asarray(ref),
                               atol=5e-2, rtol=5e-2)

    print("KERNEL_OK")
</pallas_src>

<mosaic_0001>
module attributes {stable_mosaic.version = 11 : i64} {
  func.func @_mhsa_kernel(%arg0: i32, %arg1: i32, %arg2: memref<2x8x32xf32, #tpu.memory_space<vmem>>, %arg3: memref<1x32x24xbf16, #tpu.memory_space<vmem>>, %arg4: memref<1x1x24xf32, #tpu.memory_space<vmem>>, %arg5: memref<1x8x32xbf16, #tpu.memory_space<vmem>>, %arg6: memref<1x32xf32, #tpu.memory_space<vmem>>, %arg7: memref<1x32xf32, #tpu.memory_space<vmem>>, %arg8: memref<1x32xf32, #tpu.memory_space<vmem>>, %arg9: memref<2x8x32xf32, #tpu.memory_space<vmem>>, %arg10: memref<16x32xf32, #tpu.memory_space<vmem>>) attributes {dimension_semantics = [#tpu.dimension_semantics<parallel>, #tpu.dimension_semantics<arbitrary>], iteration_bounds = array<i64: 1, 4>, scalar_prefetch = 0 : i64, scratch_operands = 1 : i64, tpu.core_type = #tpu.core_type<tc>, window_params = [{transform_indices = @transform_0, window_bounds = array<i64: 2, 8, 32>}, {transform_indices = @transform_1, window_bounds = array<i64: 1, 32, 24>}, {transform_indices = @transform_2, window_bounds = array<i64: 1, 1, 24>}, {transform_indices = @transform_3, window_bounds = array<i64: 1, 8, 32>}, {pipeline_mode = #tpu.pipeline_mode<synchronous>, transform_indices = @transform_4, window_bounds = array<i64: 1, 32>}, {pipeline_mode = #tpu.pipeline_mode<synchronous>, transform_indices = @transform_5, window_bounds = array<i64: 1, 32>}, {pipeline_mode = #tpu.pipeline_mode<synchronous>, transform_indices = @transform_6, window_bounds = array<i64: 1, 32>}, {transform_indices = @transform_7, window_bounds = array<i64: 2, 8, 32>}]} {
    %c0 = arith.constant 0 : index
    %c0_0 = arith.constant 0 : index
    %c0_1 = arith.constant 0 : index
    %0 = vector.load %arg2[%c0, %c0_0, %c0_1] : memref<2x8x32xf32, #tpu.memory_space<vmem>>, vector<2x8x32xf32>
    %1 = vector.shape_cast %0 : vector<2x8x32xf32> to vector<16x32xf32>
    %2 = arith.truncf %1 : vector<16x32xf32> to vector<16x32xbf16>
    %c0_2 = arith.constant 0 : index
    %c0_3 = arith.constant 0 : index
    %c0_4 = arith.constant 0 : index
    %3 = vector.load %arg3[%c0_2, %c0_3, %c0_4] : memref<1x32x24xbf16, #tpu.memory_space<vmem>>, vector<1x32x24xbf16>
    %4 = vector.shape_cast %3 : vector<1x32x24xbf16> to vector<32x24xbf16>
    %cst = arith.constant dense<0.000000e+00> : vector<16x24xf32>
    %5 = tpu.matmul %2, %4, %cst {dimension_numbers = #tpu.dot_dimension_numbers<[1], [0], [0], [1], [0, 0, 1, 1], [], []>} : vector<16x32xbf16>, vector<32x24xbf16>, vector<16x24xf32> -> vector<16x24xf32>
    %c0_5 = arith.constant 0 : index
    %c0_6 = arith.constant 0 : index
    %c0_7 = arith.constant 0 : index
    %6 = vector.load %arg4[%c0_5, %c0_6, %c0_7] : memref<1x1x24xf32, #tpu.memory_space<vmem>>, vector<1x1x24xf32>
    %7 = vector.shape_cast %6 : vector<1x1x24xf32> to vector<1x24xf32>
    %8 = vector.broadcast %7 : vector<1x24xf32> to vector<16x24xf32>
    %9 = arith.addf %5, %8 : vector<16x24xf32>
    %10 = vector.extract_strided_slice %9 {offsets = [0, 0], sizes = [16, 8], strides = [1, 1]} : vector<16x24xf32> to vector<16x8xf32>
    %cst_8 = arith.constant 0.353553385 : f32
    %11 = vector.broadcast %cst_8 : f32 to vector<16x8xf32>
    %12 = arith.mulf %10, %11 : vector<16x8xf32>
    %13 = arith.truncf %12 : vector<16x8xf32> to vector<16x8xbf16>
    %14 = vector.shape_cast %13 : vector<16x8xbf16> to vector<2x8x8xbf16>
    %15 = vector.extract_strided_slice %9 {offsets = [0, 8], sizes = [16, 8], strides = [1, 1]} : vector<16x24xf32> to vector<16x8xf32>
    %16 = arith.truncf %15 : vector<16x8xf32> to vector<16x8xbf16>
    %17 = vector.shape_cast %16 : vector<16x8xbf16> to vector<2x8x8xbf16>
    %18 = vector.extract_strided_slice %9 {offsets = [0, 16], sizes = [16, 8], strides = [1, 1]} : vector<16x24xf32> to vector<16x8xf32>
    %19 = arith.truncf %18 : vector<16x8xf32> to vector<16x8xbf16>
    %20 = vector.shape_cast %19 : vector<16x8xbf16> to vector<2x8x8xbf16>
    "tpu.trace_start"() <{level = 10 : i32, message = "bqd,bkd->bqk"}> : () -> ()
    %cst_9 = arith.constant dense<0.000000e+00> : vector<2x8x8xf32>
    %21 = tpu.matmul %14, %17, %cst_9 {dimension_numbers = #tpu.dot_dimension_numbers<[2], [2], [1], [1], [0, 0, 0, 1, 1, 1], [0], [0]>} : vector<2x8x8xbf16>, vector<2x8x8xbf16>, vector<2x8x8xf32> -> vector<2x8x8xf32>
    "tpu.trace_stop"() : () -> ()
    %cst_10 = arith.constant dense<0xFF800000> : vector<2x8xf32>
    %22 = vector.multi_reduction <maximumf>, %21, %cst_10 [2] : vector<2x8x8xf32> to vector<2x8xf32>
    %23 = vector.shape_cast %22 : vector<2x8xf32> to vector<2x8x1xf32>
    %24 = vector.broadcast %23 : vector<2x8x1xf32> to vector<2x8x8xf32>
    %25 = arith.subf %21, %24 : vector<2x8x8xf32>
    %26 = math.exp %25 : vector<2x8x8xf32>
    %cst_11 = arith.constant dense<0.000000e+00> : vector<2x8xf32>
    %27 = vector.multi_reduction <add>, %26, %cst_11 [2] : vector<2x8x8xf32> to vector<2x8xf32>
    %28 = vector.shape_cast %27 : vector<2x8xf32> to vector<2x8x1xf32>
    %29 = tpu.reciprocal %28 {approx = true} : vector<2x8x1xf32> -> vector<2x8x1xf32>
    %30 = vector.broadcast %29 : vector<2x8x1xf32> to vector<2x8x8xf32>
    %31 = arith.mulf %26, %30 : vector<2x8x8xf32>
    %32 = arith.truncf %31 : vector<2x8x8xf32> to vector<2x8x8xbf16>
    "tpu.trace_start"() <{level = 10 : i32, message = "bqk,bkd->bqd"}> : () -> ()
    %cst_12 = arith.constant dense<0.000000e+00> : vector<2x8x8xf32>
    %33 = tpu.matmul %32, %20, %cst_12 {dimension_numbers = #tpu.dot_dimension_numbers<[2], [1], [1], [2], [0, 0, 0, 1, 1, 2], [0], [0]>} : vector<2x8x8xbf16>, vector<2x8x8xbf16>, vector<2x8x8xf32> -> vector<2x8x8xf32>
    "tpu.trace_stop"() : () -> ()
    %34 = vector.shape_cast %33 : vector<2x8x8xf32> to vector<16x8xf32>
    %35 = arith.truncf %34 : vector<16x8xf32> to vector<16x8xbf16>
    %c0_13 = arith.constant 0 : index
    %c0_14 = arith.constant 0 : index
    %c0_15 = arith.constant 0 : index
    %36 = vector.load %arg5[%c0_13, %c0_14, %c0_15] : memref<1x8x32xbf16, #tpu.memory_space<vmem>>, vector<1x8x32xbf16>
    %37 = vector.shape_cast %36 : vector<1x8x32xbf16> to vector<8x32xbf16>
    %cst_16 = arith.constant dense<0.000000e+00> : vector<16x32xf32>
    %38 = tpu.matmul %35, %37, %cst_16 {dimension_numbers = #tpu.dot_dimension_numbers<[1], [0], [0], [1], [0, 0, 1, 1], [], []>} : vector<16x8xbf16>, vector<8x32xbf16>, vector<16x32xf32> -> vector<16x32xf32>
    %c0_i32 = arith.constant 0 : i32
    %39 = arith.cmpi eq, %arg1, %c0_i32 : i32
    %40 = arith.extui %39 : i1 to i32
    %c0_i32_17 = arith.constant 0 : i32
    %41 = arith.cmpi ne, %40, %c0_i32_17 : i32
    scf.if %41 {
      %cst_23 = arith.constant 0.000000e+00 : f32
      %48 = vector.broadcast %cst_23 : f32 to vector<16x32xf32>
      %c0_24 = arith.constant 0 : index
      %c0_25 = arith.constant 0 : index
      %49 = vector.load %arg10[%c0_24, %c0_25] : memref<16x32xf32, #tpu.memory_space<vmem>>, vector<16x32xf32>
      tpu.vector_store %arg10[%c0_24, %c0_25], %48 {strides = array<i32>} : memref<16x32xf32, #tpu.memory_space<vmem>>, vector<16x32xf32>,
    } else {
    }
    %c0_18 = arith.constant 0 : index
    %c0_19 = arith.constant 0 : index
    %42 = vector.load %arg10[%c0_18, %c0_19] : memref<16x32xf32, #tpu.memory_space<vmem>>, vector<16x32xf32>
    %43 = arith.addf %42, %38 : vector<16x32xf32>
    %c0_20 = arith.constant 0 : index
    %c0_21 = arith.constant 0 : index
    %44 = vector.load %arg10[%c0_20, %c0_21] : memref<16x32xf32, #tpu.memory_space<vmem>>, vector<16x32xf32>
    tpu.vector_store %arg10[%c0_20, %c0_21], %43 {strides = array<i32>} : memref<16x32xf32, #tpu.memory_space<vmem>>, vector<16x32xf32>,
    %c3_i32 = arith.constant 3 : i32
    %45 = arith.cmpi eq, %arg1, %c3_i32 : i32
    %46 = arith.extui %45 : i1 to i32
    %c0_i32_22 = arith.constant 0 : i32
    %47 = arith.cmpi ne, %46, %c0_i32_22 : i32
    scf.if %47 {
      %c0_23 = arith.constant 0 : index
      %c0_24 = arith.constant 0 : index
      %48 = vector.load %arg10[%c0_23, %c0_24] : memref<16x32xf32, #tpu.memory_space<vmem>>, vector<16x32xf32>
      %c0_25 = arith.constant 0 : index
      %c0_26 = arith.constant 0 : index
      %49 = vector.load %arg6[%c0_25, %c0_26] : memref<1x32xf32, #tpu.memory_space<vmem>>, vector<1x32xf32>
      %50 = vector.broadcast %49 : vector<1x32xf32> to vector<16x32xf32>
      %51 = arith.addf %48, %50 : vector<16x32xf32>
      %52 = arith.addf %1, %51 : vector<16x32xf32>
      %cst_27 = arith.constant dense<0.000000e+00> : vector<16xf32>
      %53 = vector.multi_reduction <add>, %52, %cst_27 [1] : vector<16x32xf32> to vector<16xf32>
      %54 = vector.shape_cast %53 : vector<16xf32> to vector<16x1xf32>
      %cst_28 = arith.constant 3.200000e+01 : f32
      %55 = vector.broadcast %cst_28 : f32 to vector<16x1xf32>
      %56 = arith.divf %54, %55 : vector<16x1xf32>
      %57 = vector.broadcast %56 : vector<16x1xf32> to vector<16x32xf32>
      %58 = arith.subf %52, %57 : vector<16x32xf32>
      %59 = arith.mulf %58, %58 : vector<16x32xf32>
      %cst_29 = arith.constant dense<0.000000e+00> : vector<16xf32>
      %60 = vector.multi_reduction <add>, %59, %cst_29 [1] : vector<16x32xf32> to vector<16xf32>
      %61 = vector.shape_cast %60 : vector<16xf32> to vector<16x1xf32>
      %cst_30 = arith.constant 3.200000e+01 : f32
      %62 = vector.broadcast %cst_30 : f32 to vector<16x1xf32>
      %63 = arith.divf %61, %62 : vector<16x1xf32>
      %cst_31 = arith.constant 9.99999974E-6 : f32
      %64 = vector.broadcast %cst_31 : f32 to vector<16x1xf32>
      %65 = arith.addf %63, %64 : vector<16x1xf32>
      %66 = math.rsqrt %65 : vector<16x1xf32>
      %67 = vector.broadcast %66 : vector<16x1xf32> to vector<16x32xf32>
      %68 = arith.mulf %58, %67 : vector<16x32xf32>
      %c0_32 = arith.constant 0 : index
      %c0_33 = arith.constant 0 : index
      %69 = vector.load %arg7[%c0_32, %c0_33] : memref<1x32xf32, #tpu.memory_space<vmem>>, vector<1x32xf32>
      %70 = vector.broadcast %69 : vector<1x32xf32> to vector<16x32xf32>
      %71 = arith.mulf %68, %70 : vector<16x32xf32>
      %c0_34 = arith.constant 0 : index
      %c0_35 = arith.constant 0 : index
      %72 = vector.load %arg8[%c0_34, %c0_35] : memref<1x32xf32, #tpu.memory_space<vmem>>, vector<1x32xf32>
      %73 = vector.broadcast %72 : vector<1x32xf32> to vector<16x32xf32>
      %74 = arith.addf %71, %73 : vector<16x32xf32>
      %75 = vector.shape_cast %74 : vector<16x32xf32> to vector<2x8x32xf32>
      %c0_36 = arith.constant 0 : index
      %c0_37 = arith.constant 0 : index
      %c0_38 = arith.constant 0 : index
      %76 = vector.load %arg9[%c0_36, %c0_37, %c0_38] : memref<2x8x32xf32, #tpu.memory_space<vmem>>, vector<2x8x32xf32>
      tpu.vector_store %arg9[%c0_36, %c0_37, %c0_38], %75 {strides = array<i32>} : memref<2x8x32xf32, #tpu.memory_space<vmem>>, vector<2x8x32xf32>,
    } else {
    }
    return
  }
  func.func @transform_0(%arg0: i32, %arg1: i32) -> (i32, i32, i32) {
    %c0_i32 = arith.constant 0 : i32
    %c0_i32_0 = arith.constant 0 : i32
    %c0_i32_1 = arith.constant 0 : i32
    return %arg0, %c0_i32, %c0_i32_0 : i32, i32, i32
  }
  func.func @transform_1(%arg0: i32, %arg1: i32) -> (i32, i32, i32) {
    %c0_i32 = arith.constant 0 : i32
    %c0_i32_0 = arith.constant 0 : i32
    %c0_i32_1 = arith.constant 0 : i32
    return %arg1, %c0_i32, %c0_i32_0 : i32, i32, i32
  }
  func.func @transform_2(%arg0: i32, %arg1: i32) -> (i32, i32, i32) {
    %c0_i32 = arith.constant 0 : i32
    %c0_i32_0 = arith.constant 0 : i32
    %c0_i32_1 = arith.constant 0 : i32
    return %arg1, %c0_i32, %c0_i32_0 : i32, i32, i32
  }
  func.func @transform_3(%arg0: i32, %arg1: i32) -> (i32, i32, i32) {
    %c0_i32 = arith.constant 0 : i32
    %c0_i32_0 = arith.constant 0 : i32
    %c0_i32_1 = arith.constant 0 : i32
    return %arg1, %c0_i32, %c0_i32_0 : i32, i32, i32
  }
  func.func @transform_4(%arg0: i32, %arg1: i32) -> (i32, i32) {
    %c0_i32 = arith.constant 0 : i32
    %c0_i32_0 = arith.constant 0 : i32
    %c0_i32_1 = arith.constant 0 : i32
    return %c0_i32, %c0_i32_0 : i32, i32
  }
  func.func @transform_5(%arg0: i32, %arg1: i32) -> (i32, i32) {
    %c0_i32 = arith.constant 0 : i32
    %c0_i32_0 = arith.constant 0 : i32
    %c0_i32_1 = arith.constant 0 : i32
    return %c0_i32, %c0_i32_0 : i32, i32
  }
  func.func @transform_6(%arg0: i32, %arg1: i32) -> (i32, i32) {
    %c0_i32 = arith.constant 0 : i32
    %c0_i32_0 = arith.constant 0 : i32
    %c0_i32_1 = arith.constant 0 : i32
    return %c0_i32, %c0_i32_0 : i32, i32
  }
  func.func @transform_7(%arg0: i32, %arg1: i32) -> (i32, i32, i32) {
    %c0_i32 = arith.constant 0 : i32
    %c0_i32_0 = arith.constant 0 : i32
    %c0_i32_1 = arith.constant 0 : i32
    return %arg0, %c0_i32, %c0_i32_0 : i32, i32, i32
  }
}

</mosaic_0001>

<bundles_post_ra>
// kernel: tpu_custom_call.1
= control target key start
LH: loop header
LB: loop body
LE: loop exit
PB: predicated region body
PF: predicated region fallthrough
CT: control target
= control target key end

     0   :  { %12 = vsyncpa [#allocation4], 0  ;;  %s1103_s24 = smov 0   ;;  %s1105_s25 = smov 0   ;;  %s1246_s0 = inlined_call_operand.vmem [shape: f32[2,8,32], index: 0, kind: input, shape index: {}]   ;;  %s1247_s1 = inlined_call_operand.vmem [shape: bf16[4,32,24], index: 1, kind: input, shape index: {}]   ;;  %s1248_s2 = inlined_call_operand.vmem [shape: f32[4,1,24], index: 2, kind: input, shape index: {}]   ;;  %s1249_s3 = inlined_call_operand.vmem [shape: bf16[4,8,32], index: 3, kind: input, shape index: {}]   ;;  %s1250_s4 = inlined_call_operand.vmem [shape: f32[1,32], index: 4, kind: input, shape index: {}]   ;;  %s1251_s5 = inlined_call_operand.vmem [shape: f32[1,32], index: 5, kind: input, shape index: {}]   ;;  %s1252_s6 = inlined_call_operand.vmem [shape: f32[1,32], index: 6, kind: input, shape index: {}]   ;;  %s1253_s7 = inlined_call_operand.hbm [shape: f32[2,8,32], index: 7, kind: output, shape index: {}]  }
   0x1   :  { %s1107_s26 = smov 0  }
   0x2 LB: > { %s863_s27 = sadd.s32 4294967295, %s1053_s26   ;;  %s27_s28 = sadd.s32 1, %s1049_s25  ;;  %s1053_s26 = sphi %s1107_s26, %s18_s26   ;;  %s1049_s25 = sphi %s1105_s25, %s1256_s25   ;;  %s1045_s24 = sphi %s1103_s24, %s1255_s24  }
   0x3   : > { %p28_p0 = scmp.ge.s32.totalorder %s27_s28, 4  ;;  %p867_p1 = scmp.ge.s32.totalorder %s1053_s26, 1 }
   0x4   : > { %p278_p2 = scmp.lt.s32.totalorder %s1053_s26, 5 }
   0x5   : > { %s1258_s28 = smov (%p28_p0, %s27_s28), 0 }
   0x6   : > { %p279_p3 = pnand %p867_p1, %p278_p2 }
   0x7   : > { %p323_p4 = scmp.lt.s32.totalorder (!%p279_p3), %s1045_s24, 3  ;;  %v1055_v0 = vmov (!%p279_p3), 0.0   ;;  %vm1056_vm0 = vmmov (!%p279_p3), 0   ;;  %v1141_v3 = vld [vmem:[%s1246_s0] sm:$0xff] (!%p279_p3)  ;;  %v1146_v4 = vld [vmem:[%s1246_s0 + $0x8] sm:$0xff] (!%p279_p3)  ;;  %vm363_vm1 = vcmask (!%p279_p3), 261120  }
   0x8   : > { %282 = sbr.rel (%p279_p3) target bundleno = 1686 (0x696), region = 48  ;;  %911 = vmatprep.subr.bf16.mxu0 (!%p279_p3), %v1055_v0  ;;  %915 = vmatprep.mubr.msk.bf16.mxu0 (!%p279_p3), %vm1056_vm0, %v1055_v0  ;;  %v339_v5 = vpack.c.bf16 (!%p279_p3), %v1146_v4, %v1141_v3  ;;  %s1057_s18 = smov (!%p279_p3), 120   ;;  %vm423_vm2 = vcmask (!%p279_p3), 64512   ;;  %vm548_vm3 = vcmask (!%p279_p3), 1043456  }
   0x9   : > { %919 = vmatprep.subr.bf16.mxu1 (!%p279_p3), %v1055_v0  ;;  %921 = vmatprep.mubr.msk.bf16.mxu1 (!%p279_p3), %vm1056_vm0, %v1055_v0  ;;  %s1058_s19 = smov (!%p279_p3), 112   ;;  %p884_p5 = scmp.ne.s32.totalorder (!%p279_p3), %s1045_s24, 0 }
   0xf   : > { %s1129_s29 = scalar_select %p323_p4, %s1045_s24, 3 }
  0x11   : > { %s893_s30 = sshll.u32 %s1129_s29, 4  ;;  %s330_s17 = scalar_lea.vmem %s1248_s2, %s1129_s29 }
  0x12   : > { %s327_s10 = scalar_lea.vmem %s1247_s1, %s893_s30  ;;  %v871_v6 = vld [vmem:[%s330_s17] ss:$0 sm:$0xff]  ;;  %s870_s20 = sshll.u32 %s1129_s29, 2 }
  0x13   : > { %v987_v1 = vld [vmem:[%s327_s10] sm:$0xff]   ;;  %v988_v2 = vld [vmem:[%s327_s10 + $0x8] sm:$0xff]   ;;  %s334_s23 = scalar_lea.vmem %s1249_s3, %s870_s20 }
  0x14   : > { %912 = vmatpush3.bf16.msra.mxu0 %v987_v1  ;;  %v641_v55 = vld [vmem:[%s334_s23] sm:$0xf] }
  0x15   : > { %913 = vmatprep.subr.bf16.mxu0 %v1055_v0  ;;  %v646_v56 = vsel %vm548_vm3, %v641_v55, 0 }
  0x18   : > { %914 = vmatpush3.bf16.msra.mxu0 %v988_v2 }
  0x19   : > { %925 = vmatprep.subr.bf16.mxu0 %v1055_v0 }
  0x1b   : > { %916 = vmatmul.mubr.msk.bf16.vlgmr.msra.gmra.mrb[0].mxu0 %vm363_vm1, %v339_v5 }
  0x1c   : > { %927 = vmatprep.mubr.msk.bf16.mxu0 %vm1056_vm0, %v1055_v0 }
  0xee   : > { %v401_v7 = vpop.f32.mrb[0].mxu0 }
  0xef   : > { %v402_v8 = vadd.f32 %v871_v6, %v401_v7  ;;  %v917_v9 = vpop.f32.mrb[1].mxu0 }
  0xf0   : > { %v404_v10 = vpop.f32.mrb[2].mxu0 }
  0xf1   : > { %v405_v11 = vadd.f32 %v871_v6, %v404_v10  ;;  %v918_v12 = vpop.f32.mrb[3].mxu0  ;;  %v896_v13 = vpack.c.bf16 %v402_v8, %v402_v8  ;;  %v408_v17 = vmul.f32 0.35355338, %v402_v8  ;;  %v1059_v8 = vmov (!%p884_p5), 0.0  }
  0xf2   : > { %693 = vst.msk [vmem:[#allocation2] sm:$0xff] (!%p884_p5), %vm363_vm1, %v1059_v8  ;;  %694 = vst.msk [vmem:[#allocation2 + $0x8] sm:$0xff] (!%p884_p5), %vm363_vm1, %v1059_v8 }
  0xf3   : > { %421 = vrot.lane.b32.xlu0 %v896_v13, %s1057_s18  ;;  %v897_v14 = vpack.c.bf16 %v405_v11, %v405_v11  ;;  %v894_v20 = vpack.c.bf16 %v408_v17, %v408_v17  ;;  %v409_v21 = vmul.f32 0.35355338, %v405_v11 }
  0xf5   : > { %v895_v22 = vpack.c.bf16 %v409_v21, %v409_v21 }
  0xf7   : > { %471 = vrot.lane.b32.xlu0 %v897_v14, %s1057_s18 }
 0x165   : > { %v422_v15 = vpop.permute.xlu0 %421 }
 0x166   : > { %v428_v16 = vsel %vm423_vm2, %v422_v15, 0 }
 0x167   : > { %920 = vmatpush3.bf16.xpose.msra.mxu1 %v428_v16 }
 0x168   : > { %931 = vmatprep.subr.bf16.mxu1 %v1055_v0 }
 0x169   : > { %v472_v18 = vpop.permute.xlu0 %471 }
 0x16a   : > { %v477_v19 = vsel %vm423_vm2, %v472_v18, 0 }
 0x16b   : > { %926 = vmatpush3.bf16.xpose.msra.mxu0 %v477_v19 }
 0x16c   : > { %937 = vmatprep.subr.bf16.mxu0 %v1055_v0 }
 0x16e   : > { %922 = vmatmul.mubr.msk.bf16.vlgmr.msra.gmra.mrb[0].mxu1 %vm423_vm2, %v894_v20 }
 0x16f   : > { %933 = vmatprep.mubr.msk.bf16.mxu1 %vm1056_vm0, %v1055_v0 }
 0x172   : > { %928 = vmatmul.mubr.msk.bf16.vlgmr.msra.gmra.mrb[4].mxu0 %vm423_vm2, %v895_v22 }
 0x173   : > { %939 = vmatprep.mubr.msk.bf16.mxu0 %vm1056_vm0, %v1055_v0 }
 0x241   : > { %v464_v23 = vpop.f32.mrb[0].mxu1 }
 0x242   : > { %v923_v24 = vpop.f32.mrb[1].mxu1  ;;  %v519_v25 = vsel %vm423_vm2, %v464_v23, -inf }
 0x243   : > { %520 = vmax.xlane.f32.xlu1 %v519_v25  ;;  %v467_v26 = vpop.f32.mrb[2].mxu1 }
 0x244   : > { %v924_v27 = vpop.f32.mrb[3].mxu1 }
 0x245   : > { %v513_v28 = vpop.f32.mrb[4].mxu0 }
 0x246   : > { %v929_v29 = vpop.f32.mrb[5].mxu0  ;;  %v522_v30 = vsel %vm423_vm2, %v513_v28, -inf }
 0x247   : > { %523 = vmax.xlane.f32.xlu1 %v522_v30  ;;  %v516_v31 = vpop.f32.mrb[6].mxu0 }
 0x248   : > { %v930_v32 = vpop.f32.mrb[7].mxu0 }
 0x258   : > { %543 = vrot.lane.b32.xlu1 %v896_v13, %s1058_s19 }
 0x2d0   : > { %v521_v33 = vpop.xlane.xlu1 %520 }
 0x2d1   : > { %v525_v34 = vsub.f32 %v464_v23, %v521_v33 }
 0x2d3   : > { %v527_v35 = vmul.f32 1.442695, %v525_v34 }
 0x2d4   : > { %v524_v36 = vpop.xlane.xlu1 %523 }
 0x2d5   : > { %989 = vpow2.f32 %v527_v35  ;;  %v526_v37 = vsub.f32 %v513_v28, %v524_v36 }
 0x2d7   : > { %v529_v38 = vmul.f32 1.442695, %v526_v37 }
 0x2d8   : > { %v544_v39 = vpop.permute.xlu1 %543 }
 0x2d9   : > { %991 = vpow2.f32 %v529_v38  ;;  %v550_v40 = vsel %vm548_vm3, %v544_v39, 0 }
 0x2da   : > { %932 = vmatpush3.bf16.msra.mxu1 %v550_v40 }
 0x2db   : > { %943 = vmatprep.subr.bf16.mxu1 %v1055_v0 }
 0x2df   : > { %v990_v41 = vpop.eup %989 }
 0x2e0   : > { %v531_v42 = vsel %vm423_vm2, %v990_v41, 0.0 }
 0x2e1   : > { %532 = vadd.xlane.f32.xlu0 %v531_v42 }
 0x2e3   : > { %v992_v43 = vpop.eup %991 }
 0x2e4   : > { %v534_v44 = vsel %vm423_vm2, %v992_v43, 0.0 }
 0x2e5   : > { %535 = vadd.xlane.f32.xlu1 %v534_v44 }
 0x2f6   : > { %592 = vrot.lane.b32.xlu1 %v897_v14, %s1058_s19 }
 0x36e   : > { %v533_v45 = vpop.xlane.xlu0 %532 }
 0x36f   : > { %993 = vrcp.f32 %v533_v45 }
 0x372   : > { %v536_v46 = vpop.xlane.xlu1 %535 }
 0x373   : > { %995 = vrcp.f32 %v536_v46 }
 0x376   : > { %v593_v47 = vpop.permute.xlu1 %592 }
 0x377   : > { %v598_v48 = vsel %vm548_vm3, %v593_v47, 0 }
 0x378   : > { %938 = vmatpush3.bf16.msra.mxu0 %v598_v48 }
 0x379   : > { %v994_v49 = vpop.eup %993 }
 0x37a   : > { %v539_v50 = vmul.f32 %v994_v49, %v990_v41 }
 0x37c   : > { %v541_v51 = vpack.c.bf16 %v539_v50, %v539_v50 }
 0x37d   : > { %v996_v52 = vpop.eup %995 }
 0x37e   : > { %v540_v53 = vmul.f32 %v996_v52, %v992_v43  ;;  %934 = vmatmul.mubr.msk.bf16.vlgmr.msra.gmra.mrb[4].mxu1 %vm423_vm2, %v541_v51 }
 0x37f   : > { %945 = vmatprep.mubr.msk.bf16.mxu1 %vm1056_vm0, %v1055_v0  ;;  %944 = vmatpush3.bf16.msra.mxu1 %v646_v56 }
 0x380   : > { %v542_v54 = vpack.c.bf16 %v540_v53, %v540_v53 }
 0x382   : > { %940 = vmatmul.mubr.msk.bf16.vlgmr.msra.gmra.mrb[8].mxu0 %vm423_vm2, %v542_v54 }
 0x451   : > { %v586_v57 = vpop.f32.mrb[4].mxu1 }
 0x452   : > { %v935_v58 = vpop.f32.mrb[5].mxu1 }
 0x453   : > { %v589_v59 = vpop.f32.mrb[6].mxu1 }
 0x454   : > { %v936_v60 = vpop.f32.mrb[7].mxu1 }
 0x455   : > { %v634_v61 = vpop.f32.mrb[8].mxu0 }
 0x456   : > { %v640_v62 = vpack.c.bf16 %v634_v61, %v586_v57  ;;  %v941_v63 = vpop.f32.mrb[9].mxu0 }
 0x457   : > { %v637_v0 = vpop.f32.mrb[10].mxu0 }
 0x458   : > { %v942_v1 = vpop.f32.mrb[11].mxu0  ;;  %946 = vmatmul.mubr.msk.bf16.vlgmr.msra.gmra.mrb[8].mxu1 %vm423_vm2, %v640_v62 }
 0x528   : > { %692 = sbr.rel (%p884_p5) target bundleno = 1327 (0x52f), region = 52 }
 0x52b   : > { %v682_v2 = vpop.f32.mrb[8].mxu1 }
 0x52c   : > { %v947_v5 = vpop.f32.mrb[9].mxu1 }
 0x52d   : > { %v685_v6 = vpop.f32.mrb[10].mxu1 }
 0x52e   : > { %v948_v7 = vpop.f32.mrb[11].mxu1 }
 0x52f PF: > { %v695_v9 = vld [vmem:[#allocation2] sm:$0xff]  ;;  %v696_v10 = vld [vmem:[#allocation2 + $0x8] sm:$0xff]  ;;  %p885_p6 = scmp.ne.s32.totalorder %s1045_s24, 3 }
 0x530   : > { %v697_v11 = vadd.f32 %v695_v9, %v682_v2  ;;  %v698_v12 = vadd.f32 %v696_v10, %v685_v6  ;;  %v886_v14 = vld [vmem:[%s1250_s4] ss:$0 sm:$0xff] (!%p885_p6) }
 0x531   : > { %704 = sbr.rel (%p885_p6) target bundleno = 1660 (0x67c), region = 56  ;;  %v887_v37 = vld [vmem:[%s1251_s5] ss:$0 sm:$0xff] (!%p885_p6) }
 0x532   : > { %699 = vst.msk [vmem:[#allocation2] sm:$0xff] %vm363_vm1, %v697_v11  ;;  %700 = vst.msk [vmem:[#allocation2 + $0x8] sm:$0xff] %vm363_vm1, %v698_v12  ;;  %v888_v39 = vld [vmem:[%s1252_s6] ss:$0 sm:$0xff] (!%p885_p6) }
 0x539   : > { %v705_v13 = vld [vmem:[#allocation2] sm:$0xff]  ;;  %v706_v15 = vld [vmem:[#allocation2 + $0x8] sm:$0xff] }
 0x53a   : > { %v714_v16 = vadd.f32 %v886_v14, %v705_v13  ;;  %v715_v17 = vadd.f32 %v886_v14, %v706_v15 }
 0x53c   : > { %v716_v18 = vadd.f32 %v714_v16, %v1141_v3  ;;  %v717_v19 = vadd.f32 %v715_v17, %v1146_v4 }
 0x53e   : > { %v718_v20 = vsel %vm363_vm1, %v716_v18, 0.0  ;;  %v721_v21 = vsel %vm363_vm1, %v717_v19, 0.0 }
 0x53f   : > { %719 = vadd.xlane.f32.xlu0 %v718_v20 }
 0x543   : > { %722 = vadd.xlane.f32.xlu0 %v721_v21 }
 0x5cc   : > { %v720_v22 = vpop.xlane.xlu0 %719 }
 0x5cd   : > { %v725_v23 = vmul.f32 0.03125, %v720_v22 }
 0x5cf   : > { %v727_v24 = vsub.f32 %v716_v18, %v725_v23 }
 0x5d0   : > { %v723_v25 = vpop.xlane.xlu0 %722 }
 0x5d1   : > { %v726_v26 = vmul.f32 0.03125, %v723_v25  ;;  %v729_v27 = vmul.f32 %v727_v24, %v727_v24 }
 0x5d3   : > { %v728_v28 = vsub.f32 %v717_v19, %v726_v26  ;;  %v731_v29 = vsel %vm363_vm1, %v729_v27, 0.0 }
 0x5d4   : > { %732 = vadd.xlane.f32.xlu1 %v731_v29 }
 0x5d5   : > { %v730_v30 = vmul.f32 %v728_v28, %v728_v28 }
 0x5d7   : > { %v734_v3 = vsel %vm363_vm1, %v730_v30, 0.0 }
 0x5d8   : > { %735 = vadd.xlane.f32.xlu1 %v734_v3 }
 0x661   : > { %v733_v4 = vpop.xlane.xlu1 %732 }
 0x662   : > { %v737_v31 = vmul.f32 0.03125, %v733_v4 }
 0x664   : > { %v739_v32 = vadd.f32 1e-05, %v737_v31 }
 0x665   : > { %v736_v33 = vpop.xlane.xlu1 %735 }
 0x666   : > { %997 = vrsqrt.f32 %v739_v32  ;;  %v738_v34 = vmul.f32 0.03125, %v736_v33 }
 0x668   : > { %v740_v35 = vadd.f32 1e-05, %v738_v34 }
 0x66a   : > { %999 = vrsqrt.f32 %v740_v35 }
 0x670   : > { %v998_v36 = vpop.eup %997 }
 0x671   : > { %v743_v38 = vmul.f32 %v998_v36, %v727_v24 }
 0x673   : > { %v752_v40 = vmul.f32 %v887_v37, %v743_v38 }
 0x674   : > { %v1000_v41 = vpop.eup %999 }
 0x675   : > { %v761_v42 = vadd.f32 %v888_v39, %v752_v40  ;;  %v744_v43 = vmul.f32 %v1000_v41, %v728_v28 }
 0x677   : > { %763 = vst.msk [vmem:[#allocation3] sm:$0xff] %vm363_vm1, %v761_v42  ;;  %v753_v44 = vmul.f32 %v887_v37, %v744_v43 }
 0x679   : > { %v762_v45 = vadd.f32 %v888_v39, %v753_v44 }
 0x67b   : > { %764 = vst.msk [vmem:[#allocation3 + $0x8] sm:$0xff] %vm363_vm1, %v762_v45 }
 0x67c PF: > { %p1211_p7 = scmp.eq.s32.totalorder %s863_s27, 3  ;;  %s1060_s12 = smov [#allocation3]  }
 0x67d   : > { %s774_s13 = sshll.u32 %s1060_s12, 4  ;;  %s775_s13 = int_to_ptr.vmem [resolvable:$true] %s774_s13 }
 0x67e   : > { %s1001_s14 = scalar_lea.vmem %s775_s13, 256  ;;  %p1008_p11 = scmp.lt.s32.totalorder %s775_s13, %s775_s13 }
 0x67f   : > { %p1002_p8 = scmp.ne.s32.totalorder %s775_s13, %s1001_s14  ;;  %p1009_p12 = scmp.lt.s32.totalorder %s1001_s14, %s1001_s14 }
 0x681   : > { %p1003_p9 = pnand %p1002_p8, %p1211_p7  ;;  %p1010_p13 = por %p1009_p12, %p1008_p11 }
 0x683   : > { %p1004_p10 = pneg %p1003_p9 }
 0x685   : > { %p1011_p0 = pnand %p1010_p13, %p1004_p10 }
 0x687   : > { %1014 = shalt.err (!%p1011_p0)
}
 0x688   : > { %s1015_s27 = scalar_lea.hbm %s1253_s7, 256 }
 0x689   : > { %p1016_p1 = scmp.ne.s32.totalorder %s1253_s7, %s1015_s27  ;;  %p1021_p4 = scmp.lt.u32.totalorder %s1015_s27, %s1253_s7 }
 0x68b   : > { %p1017_p2 = pnand %p1016_p1, %p1211_p7 }
 0x68d   : > { %p1018_p3 = pneg %p1017_p2 }
 0x68f   : > { %p1023_p5 = pnand %p1021_p4, %p1018_p3 }
 0x691   : > { %1026 = shalt.err (!%p1023_p5)
}
 0x692   : > { %s1061_s21 = smov 128   ;;  %s1062_s22 = smov 8  }
 0x693   : > { %950 = dma.vmem_to_hbm [thread:$0]  (%p1211_p7), %s775_s13, 256, %s1253_s7, [#allocation4], %s1061_s21, %s1061_s21, %s1062_s22  }
 0x694   : > { %1040 = dma.done.wait (%p1211_p7), [#allocation4], 256  }
 0x695   : > { %1042 = vsyncadd (%p1211_p7), [#allocation4], 4294967040 }
 0x696 PF: > { %s18_s26 = sadd.s32 1, %s1053_s26   ;;  %s1255_s24 = smov %s1049_s25 }
 0x697   : > { %p15_p6 = scmp.ge.s32.totalorder %s18_s26, 6   ;;  %s1256_s25 = smov %s1258_s28 }
 0x699   :  { %17 = sbr.rel (!%p15_p6) target bundleno = 2 (0x2), region = 93 }
 0x6a0   :  { %790 = vsyncpa [#allocation4], 1 }
 0x6a1   :  { %792 = vsyncpa [#allocation4 + $0x1], 1 }

</bundles_post_ra>
